<compile_context>
chip_gen: v6e
topology: v6e:2x2x1
jax: 0.10.0
libtpu: 0.0.40
codegen_flags: <defaults>
</compile_context>

<pallas_src>
import functools

import jax
import jax.numpy as jnp
from jax.experimental import pallas as pl
from jax.experimental.pallas import tpu as pltpu


def _round_up(x, m):
    return (x + m - 1) // m * m


def _fused_conv_relu_kernel(x_ref, w_ref, o_ref, *, kh, kw, W, stride, Qp, cin_p):
    # x_ref: (1, cin_p, HWp)        bf16  one image: channels on sublanes, flat H*W on lanes
    # w_ref: (cop, kh*kw*cin_p)     bf16  tap-major (ki,kj), input-channel minor
    # o_ref: (1, cop, Qp)           f32   full-width output rows, lane-dense along spatial
    x_img = x_ref[0] if stride == 1 else None            # (cin_p, HWp), DMA'd/loaded once

    # Fused im2col: stack the kh*kw shifted windows along the contraction (sublane) axis.
    taps = []
    for ki in range(kh):
        for kj in range(kw):
            shift = ki * W + kj                           # static flat offset of this tap
            if stride == 1:
                taps.append(x_img[:, shift:shift + Qp])   # (cin_p, Qp) shifted window
            else:
                taps.append(x_ref[0, :, pl.ds(shift, Qp, stride=stride)])
    patch = jnp.concatenate(taps, axis=0)                 # (kh*kw*cin_p, Qp) bf16

    # Single MXU contraction per image, f32 accumulation, fused ReLU on the way out.
    acc = jnp.dot(w_ref[...], patch, preferred_element_type=jnp.float32)  # (cop, Qp)
    o_ref[0] = jnp.maximum(acc, 0.0)


@functools.partial(jax.jit, static_argnames=("stride",))
def conv_block_forward(x, weight, stride):
    """ConvBlock forward: y = relu(conv2d(x, weight, stride, padding=0, bias=None))."""
    B, C_in, H, W = x.shape
    C_out, _, kh, kw = weight.shape
    Ho = (H - kh) // stride + 1
    Wo = (W - kw) // stride + 1

    cin_p = _round_up(C_in, 16)             # bf16 sublane packing => tile-aligned tap rows
    cop = _round_up(C_out, 8)               # f32 output sublane tile
    Q = Ho * W                              # full-width output rows, flattened (cropped later)
    Qp = _round_up(Q, 128)                  # lane-dense output width
    max_shift = (kh - 1) * W + (kw - 1)
    HWp = _round_up(stride * (Qp - 1) + max_shift + 1, 128)

    # Input: NCHW -> (B, cin_p, HWp) bf16 with spatial dims flattened onto lanes.
    x_flat = jnp.pad(x.reshape(B, C_in, H * W).astype(jnp.bfloat16),
                     ((0, 0), (0, cin_p - C_in), (0, HWp - H * W)))

    # Weight: (C_out, C_in, kh, kw) -> (cop, kh*kw*cin_p) bf16, tap-major / channel-minor,
    # matching the in-kernel patch stacking order.
    w = jnp.pad(weight.astype(jnp.bfloat16),
                ((0, cop - C_out), (0, cin_p - C_in), (0, 0), (0, 0)))
    w = jnp.transpose(w, (0, 2, 3, 1)).reshape(cop, kh * kw * cin_p)

    kernel = functools.partial(_fused_conv_relu_kernel, kh=kh, kw=kw, W=W,
                               stride=stride, Qp=Qp, cin_p=cin_p)

    flops = 2 * B * cop * (kh * kw * cin_p) * Qp
    bytes_accessed = x_flat.size * 2 + w.size * 2 + B * cop * Qp * 4

    out = pl.pallas_call(
        kernel,
        out_shape=jax.ShapeDtypeStruct((B, cop, Qp), jnp.float32),
        grid_spec=pltpu.PrefetchScalarGridSpec(
            num_scalar_prefetch=0,
            grid=(B,),
            in_specs=[
                pl.BlockSpec((1, cin_p, HWp), lambda b: (b, 0, 0)),      # one image / step
                pl.BlockSpec((cop, kh * kw * cin_p), lambda b: (0, 0)),  # weights resident
            ],
            out_specs=pl.BlockSpec((1, cop, Qp), lambda b: (b, 0, 0)),
        ),
        compiler_params=pltpu.CompilerParams(
            dimension_semantics=("parallel",),          # shard batch across TensorCores
            vmem_limit_bytes=32 * 1024 * 1024),
        cost_estimate=pl.CostEstimate(flops=flops, transcendentals=0,
                                      bytes_accessed=bytes_accessed),
    )(x_flat, w)

    # Crop channels, valid flat positions, then valid output columns -> already NCHW.
    y = out[:, :C_out, :Q].reshape(B, C_out, Ho, W)[:, :, :, :Wo]
    return y


def _reference(x, weight, stride):
    y = jax.lax.conv_general_dilated(
        x, weight, window_strides=(stride, stride), padding="VALID",
        dimension_numbers=("NCHW", "OIHW", "NCHW"))
    return jnp.maximum(y, 0.0)


if __name__ == "__main__":
    # Small shapes consistent with the module: ConvBlock(in=4, out=8, kernel=3, stride=1)
    B, C_in, H, W = 2, 4, 16, 16
    C_out, ksize, stride = 8, 3, 1

    key = jax.random.PRNGKey(0)
    kx, kw_ = jax.random.split(key)
    x = jax.random.normal(kx, (B, C_in, H, W), dtype=jnp.float32)
    # Deterministic kaiming-ish init for Conv2d weight (C_out, C_in, kh, kw), bias=False.
    fan_in = C_in * ksize * ksize
    weight = jax.random.normal(kw_, (C_out, C_in, ksize, ksize),
                               dtype=jnp.float32) * (2.0 / fan_in) ** 0.5

    y = conv_block_forward(x, weight, stride)
    jax.block_until_ready(y)

    y_ref = _reference(x, weight, stride)
    assert y.shape == (B, C_out, H - ksize + 1, W - ksize + 1), y.shape
    # bf16 operands (f32 accumulation) -> looser tolerance than a pure-f32 version.
    max_err = float(jnp.max(jnp.abs(y - y_ref)))
    assert jnp.allclose(y, y_ref, atol=1e-1, rtol=5e-2), max_err

    print("KERNEL_OK")
</pallas_src>

<mosaic_0001>
module attributes {stable_mosaic.version = 11 : i64} {
  func.func @_fused_conv_relu_kernel(%arg0: i32, %arg1: memref<1x16x384xbf16, #tpu.memory_space<vmem>>, %arg2: memref<8x144xbf16, #tpu.memory_space<vmem>>, %arg3: memref<1x8x256xf32, #tpu.memory_space<vmem>>) attributes {dimension_semantics = [#tpu.dimension_semantics<parallel>], iteration_bounds = array<i64: 2>, scalar_prefetch = 0 : i64, scratch_operands = 0 : i64, tpu.core_type = #tpu.core_type<tc>, window_params = [{transform_indices = @transform_0, window_bounds = array<i64: 1, 16, 384>}, {pipeline_mode = #tpu.pipeline_mode<synchronous>, transform_indices = @transform_1, window_bounds = array<i64: 8, 144>}, {transform_indices = @transform_2, window_bounds = array<i64: 1, 8, 256>}]} {
    %c0 = arith.constant 0 : index
    %c0_0 = arith.constant 0 : index
    %c0_1 = arith.constant 0 : index
    %0 = vector.load %arg1[%c0, %c0_0, %c0_1] : memref<1x16x384xbf16, #tpu.memory_space<vmem>>, vector<1x16x384xbf16>
    %1 = vector.shape_cast %0 : vector<1x16x384xbf16> to vector<16x384xbf16>
    %2 = vector.extract_strided_slice %1 {offsets = [0, 0], sizes = [16, 256], strides = [1, 1]} : vector<16x384xbf16> to vector<16x256xbf16>
    %3 = vector.extract_strided_slice %1 {offsets = [0, 1], sizes = [16, 256], strides = [1, 1]} : vector<16x384xbf16> to vector<16x256xbf16>
    %4 = vector.extract_strided_slice %1 {offsets = [0, 2], sizes = [16, 256], strides = [1, 1]} : vector<16x384xbf16> to vector<16x256xbf16>
    %5 = vector.extract_strided_slice %1 {offsets = [0, 16], sizes = [16, 256], strides = [1, 1]} : vector<16x384xbf16> to vector<16x256xbf16>
    %6 = vector.extract_strided_slice %1 {offsets = [0, 17], sizes = [16, 256], strides = [1, 1]} : vector<16x384xbf16> to vector<16x256xbf16>
    %7 = vector.extract_strided_slice %1 {offsets = [0, 18], sizes = [16, 256], strides = [1, 1]} : vector<16x384xbf16> to vector<16x256xbf16>
    %8 = vector.extract_strided_slice %1 {offsets = [0, 32], sizes = [16, 256], strides = [1, 1]} : vector<16x384xbf16> to vector<16x256xbf16>
    %9 = vector.extract_strided_slice %1 {offsets = [0, 33], sizes = [16, 256], strides = [1, 1]} : vector<16x384xbf16> to vector<16x256xbf16>
    %10 = vector.extract_strided_slice %1 {offsets = [0, 34], sizes = [16, 256], strides = [1, 1]} : vector<16x384xbf16> to vector<16x256xbf16>
    %11 = tpu.concatenate %2, %3, %4, %5, %6, %7, %8, %9, %10 in 0 : vector<16x256xbf16>, vector<16x256xbf16>, vector<16x256xbf16>, vector<16x256xbf16>, vector<16x256xbf16>, vector<16x256xbf16>, vector<16x256xbf16>, vector<16x256xbf16>, vector<16x256xbf16> -> vector<144x256xbf16>
    %c0_2 = arith.constant 0 : index
    %c0_3 = arith.constant 0 : index
    %12 = vector.load %arg2[%c0_2, %c0_3] : memref<8x144xbf16, #tpu.memory_space<vmem>>, vector<8x144xbf16>
    %cst = arith.constant dense<0.000000e+00> : vector<8x256xf32>
    %13 = tpu.matmul %12, %11, %cst {dimension_numbers = #tpu.dot_dimension_numbers<[1], [0], [0], [1], [0, 0, 1, 1], [], []>} : vector<8x144xbf16>, vector<144x256xbf16>, vector<8x256xf32> -> vector<8x256xf32>
    %cst_4 = arith.constant 0.000000e+00 : f32
    %14 = vector.broadcast %cst_4 : f32 to vector<8x256xf32>
    %15 = arith.maximumf %13, %14 : vector<8x256xf32>
    %c0_5 = arith.constant 0 : index
    %c0_6 = arith.constant 0 : index
    %c0_7 = arith.constant 0 : index
    %16 = vector.load %arg3[%c0_5, %c0_6, %c0_7] : memref<1x8x256xf32, #tpu.memory_space<vmem>>, vector<1x8x256xf32>
    %17 = vector.shape_cast %16 : vector<1x8x256xf32> to vector<8x256xf32>
    %18 = vector.shape_cast %15 : vector<8x256xf32> to vector<1x8x256xf32>
    tpu.vector_store %arg3[%c0_5, %c0_6, %c0_7], %18 {strides = array<i32>} : memref<1x8x256xf32, #tpu.memory_space<vmem>>, vector<1x8x256xf32>,
    return
  }
  func.func @transform_0(%arg0: i32) -> (i32, i32, i32) {
    %c0_i32 = arith.constant 0 : i32
    %c0_i32_0 = arith.constant 0 : i32
    %c0_i32_1 = arith.constant 0 : i32
    return %arg0, %c0_i32, %c0_i32_0 : i32, i32, i32
  }
  func.func @transform_1(%arg0: i32) -> (i32, i32) {
    %c0_i32 = arith.constant 0 : i32
    %c0_i32_0 = arith.constant 0 : i32
    %c0_i32_1 = arith.constant 0 : i32
    return %c0_i32, %c0_i32_0 : i32, i32
  }
  func.func @transform_2(%arg0: i32) -> (i32, i32, i32) {
    %c0_i32 = arith.constant 0 : i32
    %c0_i32_0 = arith.constant 0 : i32
    %c0_i32_1 = arith.constant 0 : i32
    return %arg0, %c0_i32, %c0_i32_0 : i32, i32, i32
  }
}

</mosaic_0001>

<bundles_post_ra>
// kernel: conv_block_forward.1
= control target key start
LH: loop header
LB: loop body
LE: loop exit
PB: predicated region body
PF: predicated region fallthrough
CT: control target
= control target key end

     0   :  { %s434_s9 = smov 0   ;;  %s486_s0 = inlined_call_operand.vmem [shape: bf16[2,16,384], index: 0, kind: input, shape index: {}]   ;;  %s487_s1 = inlined_call_operand.vmem [shape: bf16[8,144], index: 1, kind: input, shape index: {}]   ;;  %s488_s2 = inlined_call_operand.vmem [shape: f32[2,8,256], index: 2, kind: output, shape index: {}]  }
   0x1 LB: > { %s363_s10 = sadd.s32 4294967295, %s409_s9   ;;  %p367_p0 = scmp.ge.s32.totalorder %s409_s9, 1  ;;  %s409_s9 = sphi %s434_s9, %s12_s9  }
   0x2   : > { %p112_p1 = scmp.lt.s32.totalorder %s409_s9, 3 }
   0x4   : > { %p113_p2 = pnand %p367_p0, %p112_p1 }
   0x5   : > { %p134_p3 = scmp.lt.s32.totalorder (!%p113_p2), %s363_s10, 1  ;;  %s411_s15 = smov (!%p113_p2), 95  }
   0x6   : > { %116 = sbr.rel (%p113_p2) target bundleno = 382 (0x17e), region = 28  ;;  %s412_s16 = smov (!%p113_p2), 96  }
   0x7   : > { %s413_s17 = smov (!%p113_p2), 110   ;;  %s414_s18 = smov (!%p113_p2), 111  }
   0x8   : > { %s415_s19 = smov (!%p113_p2), 112   ;;  %s416_s20 = smov (!%p113_p2), 126  }
   0x9   : > { %s417_s21 = smov (!%p113_p2), 127   ;;  %s418_s24 = smov (!%p113_p2), 94  }
   0xb   : > { %s490_s10 = smov (!%p134_p3, %s363_s10), 1  ;;  %v468_v3 = vld [vmem:[%s487_s1] sm:$0xff]  ;;  %vm259_vm0 = vcmask 130048   ;;  %vm236_vm1 = vcmask 777216   ;;  %vm225_vm2 = vcmask 785408   ;;  %vm214_vm3 = vcmask 900096  }
   0xc   : > { %s380_s11 = smul.u32 24, %s490_s10  ;;  %v375_v4 = vcombine.high %v468_v3, %v468_v3  ;;  %vm203_vm4 = vcmask 908288   ;;  %vm192_vm5 = vcmask 916480   ;;  %vm181_vm6 = vcmask 1031168   ;;  %s379_s25 = sshll.u32 %s490_s10, 4 }
   0xd   : > { %vm170_vm7 = vcmask 1039360   ;;  %vm247_vm8 = vcmask 769024   ;;  %v374_v45 = vcombine.low %v468_v3, %v468_v3  ;;  %s143_s28 = scalar_lea.vmem %s488_s2, %s379_s25 }
   0xe   : > { %s138_s14 = scalar_lea.vmem %s486_s0, %s380_s11  ;;  %376 = vmatprep.mubr.msk.bf16.mxu0 %vm259_vm0, %v375_v4 }
   0xf   : > { %v448_v0 = vld [vmem:[%s138_s14 + $0x4] ss:$12 sps:$4 sm:$0xff]   ;;  %v450_v1 = vld [vmem:[%s138_s14] ss:$12 sps:$4 sm:$0xff]   ;;  %v400_v2 = vld [vmem:[%s138_s14 + $0x8] ss:$12 sps:$4 sm:$0xff]  }
  0x10   : > { %232 = vrot.lane.b32.xlu0 %v448_v0, %s411_s15  ;;  %230 = vrot.lane.b32.xlu1 %v450_v1, %s411_s15 }
  0x14   : > { %234 = vrot.lane.b32.xlu0 %v400_v2, %s411_s15  ;;  %221 = vrot.lane.b32.xlu1 %v448_v0, %s412_s16 }
  0x18   : > { %223 = vrot.lane.b32.xlu0 %v400_v2, %s412_s16  ;;  %219 = vrot.lane.b32.xlu1 %v450_v1, %s412_s16 }
  0x1c   : > { %210 = vrot.lane.b32.xlu0 %v448_v0, %s413_s17  ;;  %212 = vrot.lane.b32.xlu1 %v400_v2, %s413_s17 }
  0x20   : > { %208 = vrot.lane.b32.xlu0 %v450_v1, %s413_s17  ;;  %199 = vrot.lane.b32.xlu1 %v448_v0, %s414_s18 }
  0x24   : > { %201 = vrot.lane.b32.xlu0 %v400_v2, %s414_s18  ;;  %197 = vrot.lane.b32.xlu1 %v450_v1, %s414_s18 }
  0x28   : > { %188 = vrot.lane.b32.xlu0 %v448_v0, %s415_s19  ;;  %190 = vrot.lane.b32.xlu1 %v400_v2, %s415_s19 }
  0x2c   : > { %186 = vrot.lane.b32.xlu0 %v450_v1, %s415_s19  ;;  %177 = vrot.lane.b32.xlu1 %v448_v0, %s416_s20 }
  0x30   : > { %179 = vrot.lane.b32.xlu0 %v400_v2, %s416_s20  ;;  %175 = vrot.lane.b32.xlu1 %v450_v1, %s416_s20 }
  0x34   : > { %166 = vrot.lane.b32.xlu0 %v448_v0, %s417_s21  ;;  %168 = vrot.lane.b32.xlu1 %v400_v2, %s417_s21 }
  0x38   : > { %164 = vrot.lane.b32.xlu0 %v450_v1, %s417_s21  ;;  %243 = vrot.lane.b32.xlu1 %v448_v0, %s418_s24 }
  0x3c   : > { %245 = vrot.lane.b32.xlu0 %v400_v2, %s418_s24  ;;  %241 = vrot.lane.b32.xlu1 %v450_v1, %s418_s24 }
  0x82   : > { %v233_v5 = vpop.permute.xlu0 %232  ;;  %v231_v6 = vpop.permute.xlu1 %230 }
  0x83   : > { %v237_v10 = vsel %vm236_vm1, %v231_v6, %v233_v5 }
  0x86   : > { %v235_v7 = vpop.permute.xlu0 %234  ;;  %v222_v8 = vpop.permute.xlu1 %221 }
  0x87   : > { %v238_v9 = vsel %vm236_vm1, %v233_v5, %v235_v7 }
  0x88   : > { %263 = vmatprep.subr.bf16.mxu0 %v238_v9 }
  0x89   : > { %264 = vmatpush1.bf16.msra.mxu0 %v237_v10 }
  0x8a   : > { %v224_v11 = vpop.permute.xlu0 %223  ;;  %v220_v12 = vpop.permute.xlu1 %219 }
  0x8b   : > { %v227_v13 = vsel %vm225_vm2, %v222_v8, %v224_v11  ;;  %v226_v14 = vsel %vm225_vm2, %v220_v12, %v222_v8 }
  0x8c   : > { %265 = vmatprep.subr.bf16.mxu0 %v227_v13 }
  0x8d   : > { %266 = vmatpush1.bf16.msra.mxu0 %v226_v14 }
  0x8e   : > { %v211_v15 = vpop.permute.xlu0 %210  ;;  %v213_v16 = vpop.permute.xlu1 %212 }
  0x8f   : > { %v216_v17 = vsel %vm214_vm3, %v211_v15, %v213_v16 }
  0x90   : > { %267 = vmatprep.subr.bf16.mxu0 %v216_v17 }
  0x92   : > { %v209_v18 = vpop.permute.xlu0 %208  ;;  %v200_v19 = vpop.permute.xlu1 %199 }
  0x93   : > { %v215_v20 = vsel %vm214_vm3, %v209_v18, %v211_v15 }
  0x94   : > { %268 = vmatpush1.bf16.msra.mxu0 %v215_v20 }
  0x96   : > { %v202_v21 = vpop.permute.xlu0 %201  ;;  %v198_v22 = vpop.permute.xlu1 %197 }
  0x97   : > { %v205_v23 = vsel %vm203_vm4, %v200_v19, %v202_v21  ;;  %v204_v24 = vsel %vm203_vm4, %v198_v22, %v200_v19 }
  0x98   : > { %269 = vmatprep.subr.bf16.mxu0 %v205_v23 }
  0x99   : > { %270 = vmatpush1.bf16.msra.mxu0 %v204_v24 }
  0x9a   : > { %v189_v25 = vpop.permute.xlu0 %188  ;;  %v191_v26 = vpop.permute.xlu1 %190 }
  0x9b   : > { %v194_v27 = vsel %vm192_vm5, %v189_v25, %v191_v26 }
  0x9c   : > { %271 = vmatprep.subr.bf16.mxu0 %v194_v27 }
  0x9e   : > { %v187_v28 = vpop.permute.xlu0 %186  ;;  %v178_v29 = vpop.permute.xlu1 %177 }
  0x9f   : > { %v193_v30 = vsel %vm192_vm5, %v187_v28, %v189_v25 }
  0xa0   : > { %272 = vmatpush1.bf16.msra.mxu0 %v193_v30 }
  0xa2   : > { %v180_v31 = vpop.permute.xlu0 %179  ;;  %v176_v32 = vpop.permute.xlu1 %175 }
  0xa3   : > { %v183_v33 = vsel %vm181_vm6, %v178_v29, %v180_v31  ;;  %v182_v34 = vsel %vm181_vm6, %v176_v32, %v178_v29 }
  0xa4   : > { %273 = vmatprep.subr.bf16.mxu0 %v183_v33 }
  0xa5   : > { %274 = vmatpush1.bf16.msra.mxu0 %v182_v34 }
  0xa6   : > { %v167_v35 = vpop.permute.xlu0 %166  ;;  %v169_v36 = vpop.permute.xlu1 %168 }
  0xa7   : > { %v172_v37 = vsel %vm170_vm7, %v167_v35, %v169_v36 }
  0xa8   : > { %275 = vmatprep.subr.bf16.mxu0 %v172_v37 }
  0xaa   : > { %v165_v38 = vpop.permute.xlu0 %164  ;;  %v244_v39 = vpop.permute.xlu1 %243 }
  0xab   : > { %v171_v40 = vsel %vm170_vm7, %v165_v38, %v167_v35 }
  0xac   : > { %276 = vmatpush1.bf16.msra.mxu0 %v171_v40 }
  0xad   : > { %277 = vmatprep.subr.bf16.mxu0 %v448_v0 }
  0xae   : > { %v246_v41 = vpop.permute.xlu0 %245  ;;  %v242_v43 = vpop.permute.xlu1 %241 }
  0xaf   : > { %v249_v42 = vsel %vm247_vm8, %v244_v39, %v246_v41  ;;  %v248_v44 = vsel %vm247_vm8, %v242_v43, %v244_v39 }
  0xb0   : > { %278 = vmatpush1.bf16.msra.mxu0 %v450_v1 }
  0xb1   : > { %293 = vmatprep.subr.bf16.mxu0 %v249_v42 }
  0xb4   : > { %294 = vmatpush2.bf16.msra.mxu0 %v248_v44 }
  0xb7   : > { %296 = vmatmul.mubr.bf16.vlgmr.msra.gmra.mxu0 %v374_v45 }
 0x177   : > { %v297_v46 = vpop.f32.mrf.mxu0 }
 0x178   : > { %v304_v47 = vmax.f32 %v297_v46, 0.0 }
 0x179   : > { %v299_v48 = vpop.f32.mrf.mxu0 }
 0x17a   : > { %306 = vst [vmem:[%s143_s28] sm:$0xff] %v304_v47  ;;  %v305_v49 = vmax.f32 %v299_v48, 0.0 }
 0x17b   : > { %v301_v50 = vpop.f32.mrf.mxu0 }
 0x17c   : > { %307 = vst [vmem:[%s143_s28 + $0x8] sm:$0xff] %v305_v49 }
 0x17d   : > { %v302_v51 = vpop.f32.mrf.mxu0 }
 0x17e PF: > { %s12_s9 = sadd.s32 1, %s409_s9  }
 0x17f   : > { %p9_p4 = scmp.ge.s32.totalorder %s12_s9, 4  }
 0x181   :  { %11 = sbr.rel (!%p9_p4) target bundleno = 1 (0x1), region = 58 }

</bundles_post_ra>
